<compile_context>
chip_gen: v7x
topology: tpu7x:2x2x1
jax: 0.10.0
libtpu: 0.0.40
codegen_flags: <defaults>
</compile_context>

<pallas_src>
from functools import partial

import numpy as np
import jax
import jax.numpy as jnp
from jax.experimental import pallas as pl
from jax.experimental.pallas import tpu as pltpu


# ----------------------------------------------------------------------------
# Host-side graph construction (equivalent of init_graph, glue / index logic)
# ----------------------------------------------------------------------------
def init_graph_np(valid, step=1):
    """Numpy port of init_graph(valid, step). valid: (H, W) bool."""
    h, w = valid.shape
    u = np.arange(0, w - 1, step)
    v = np.arange(0, h - 1, step)
    u, v = np.meshgrid(u, v, indexing="xy")          # (len(v), len(u))
    anchor_valid = valid[v, u]
    u = u[anchor_valid]
    v = v[anchor_valid]
    index_map = -np.ones((h, w), dtype=np.int64)
    index_map[v, u] = np.arange(len(u))

    base = np.stack([u, v], axis=1).reshape(-1, 1, 1, 2)
    edges = np.tile(base, (1, 4, 2, 1)).copy()
    edges[:, 0, 1, 0] += step
    edges[:, 1, 1, 0] += step
    edges[:, 1, 1, 1] += step
    edges[:, 2, 1, 1] += step
    edges[:, 3, 0, 0] += step
    edges[:, 3, 1, 1] += step

    faces = np.concatenate(
        [np.tile(base, (1, 2, 1, 1)),
         np.stack([edges[:, 0:2, 1, :], edges[:, 1:3, 1, :]], axis=1)],
        axis=2)                                       # (K, 2, 3, 2)

    valid_p = np.pad(valid, ((0, step), (0, step)), constant_values=False)

    edge_ok = ~np.any(~valid_p[edges[..., 1], edges[..., 0]], axis=2)   # (K, 4)
    edges = edges[edge_ok]                                              # (?, 2, 2)
    edges = index_map[edges[..., 1], edges[..., 0]]                     # (?, 2)
    edges = edges[~np.any(edges < 0, axis=1)]

    face_ok = ~np.any(~valid_p[faces[..., 1], faces[..., 0]], axis=2)   # (K, 2)
    faces = faces[face_ok]                                              # (?, 3, 2)
    faces = index_map[faces[..., 1], faces[..., 0]]                     # (?, 3)
    faces = faces[~np.any(faces < 0, axis=1)]

    return (index_map >= 0), edges.T, faces.T


def _round_up(x, m):
    return ((x + m - 1) // m) * m


def _pad_tiles(n, tile):
    """Return (padded_size, tile_size). tile must be a multiple of 128."""
    n = max(int(n), 1)
    if n <= tile:
        p = _round_up(n, 128)
        return p, p
    return _round_up(n, tile), tile


def _select_config():
    """Per-generation tile / VMEM budget (review: do not reuse v6e tiles on v7x)."""
    vmem_bytes = 64 << 20                       # conservative default (v7x-class)
    try:
        info = pltpu.get_tpu_info()
        vmem_bytes = int(getattr(info, "vmem_capacity_bytes", vmem_bytes))
    except Exception:
        pass
    if vmem_bytes >= (100 << 20):               # v5e / v6e: 128 MiB VMEM
        return dict(tile_e=2048, tile_n=1024, tile_t=8192, vmem_limit=80 << 20)
    # v7x-class (64 MiB per TensorCore) or unknown: stay conservative.
    return dict(tile_e=1024, tile_n=1024, tile_t=4096, vmem_limit=40 << 20)


# ----------------------------------------------------------------------------
# Kernel 1: fused per-edge lengths + per-node incident-length sums
#   grid = (num_N_tiles, num_E_tiles)  -- edge (reduction) axis innermost.
#   Dense O(E*N) incidence reduction; fine for grid-mesh deform graphs (<~2K nodes).
#   TODO(synk): for N,E >~ 10k replace with an O(E) segment-sum / CSR per-node gather.
# ----------------------------------------------------------------------------
def radii_kernel(pe_ref, e01_ref, lens_ref, sums_ref):
    # pe   : (6, TE)  f32  rows 0..2 = p0.xyz, rows 3..5 = p1.xyz   (lane-dense)
    # e01  : (2, TE)  i32  rows 0/1 = endpoint node ids, padding = -1 (lane-dense)
    # lens : (1, TE)  f32  edges_lens output block (index (0, k); rewritten per node tile)
    # sums : (TN, 1)  f32  per-node sum of incident edge lengths (resident accumulator)
    k = pl.program_id(1)
    tn = sums_ref.shape[0]
    te = pe_ref.shape[1]

    # --- edge lengths (computed once per edge tile, also the edges_lens output) ---
    pe = pe_ref[...]
    d = pe[0:3, :] - pe[3:6, :]
    lens = jnp.sqrt(jnp.sum(d * d, axis=0, keepdims=True))          # (1, TE) lane-dense
    lens_ref[...] = lens

    # --- incidence hits: nodes on sublanes, edges on lanes.  Node-tile offset is
    #     folded into the (1, TE) id rows (TE ops), not the TN x TE iota. ---
    n0 = pl.program_id(0) * tn
    e0 = e01_ref[0:1, :] - n0                                        # (1, TE) i32
    e1 = e01_ref[1:2, :] - n0
    node = jax.lax.broadcasted_iota(jnp.int32, (tn, te), 0)          # (TN, TE)
    hit = (node == e0) | (node == e1)                                # padding (-1) never hits
    wlens = jnp.where(hit, lens, 0.0)                                # (TN, TE) f32

    @pl.when(k == 0)
    def _init():
        sums_ref[...] = jnp.zeros_like(sums_ref)

    # Exact f32 reduction over the edge (lane) axis.  A tiny-N MXU matmul here would be
    # pass/weight-load bound and bf16-precision-hazardous; the lane reduce is ~1 extra
    # VALU op per mask element and keeps full f32 accuracy.
    sums_ref[...] += jnp.sum(wlens, axis=1, keepdims=True)           # (TN, 1)


def radii_pallas(pe, e01, n_pad, tn, te, vmem_limit):
    e_pad = pe.shape[1]
    grid = (n_pad // tn, e_pad // te)
    return pl.pallas_call(
        radii_kernel,
        out_shape=(jax.ShapeDtypeStruct((1, e_pad), jnp.float32),     # edges_lens (lane-dense)
                   jax.ShapeDtypeStruct((n_pad, 1), jnp.float32)),    # per-node sums (tiny)
        grid_spec=pltpu.PrefetchScalarGridSpec(
            num_scalar_prefetch=0,
            grid=grid,
            in_specs=[pl.BlockSpec((6, te), lambda i, k: (0, k)),
                      pl.BlockSpec((2, te), lambda i, k: (0, k))],
            out_specs=[pl.BlockSpec((1, te), lambda i, k: (0, k)),
                       pl.BlockSpec((tn, 1), lambda i, k: (i, 0))]),
        compiler_params=pltpu.CompilerParams(
            # The edges_lens output block ignores the node-tile axis (identical rewrites),
            # so keep both axes sequential/"arbitrary" to stay deterministic.
            # TODO(synk): v7x megacore — split the edge axis across cores with per-core
            #             partial sums combined at finalize to keep the 2nd TC busy.
            dimension_semantics=("arbitrary", "arbitrary"),
            vmem_limit_bytes=vmem_limit),
    )(pe, e01)


# ----------------------------------------------------------------------------
# Kernel 2: triangle areas only (memory-bound elementwise, large tiles)
# ----------------------------------------------------------------------------
def areas_kernel(pt_ref, area_ref):
    # pt: (9, TP) f32 rows = t0.xyz, t1.xyz, t2.xyz (lane-dense)
    pt = pt_ref[...]
    a = pt[3:6, :] - pt[0:3, :]
    b = pt[6:9, :] - pt[0:3, :]
    cx = a[1:2] * b[2:3] - a[2:3] * b[1:2]
    cy = a[2:3] * b[0:1] - a[0:1] * b[2:3]
    cz = a[0:1] * b[1:2] - a[1:2] * b[0:1]
    area_ref[...] = 0.5 * jnp.sqrt(cx * cx + cy * cy + cz * cz + 1e-13)


def areas_pallas(pt, tp, vmem_limit):
    t_pad = pt.shape[1]
    return pl.pallas_call(
        areas_kernel,
        out_shape=jax.ShapeDtypeStruct((1, t_pad), jnp.float32),
        grid_spec=pltpu.PrefetchScalarGridSpec(
            num_scalar_prefetch=0,
            grid=(t_pad // tp,),
            in_specs=[pl.BlockSpec((9, tp), lambda i: (0, i))],
            out_specs=pl.BlockSpec((1, tp), lambda i: (0, i))),
        compiler_params=pltpu.CompilerParams(
            dimension_semantics=("parallel",),
            vmem_limit_bytes=vmem_limit),
    )(pt)


# ----------------------------------------------------------------------------
# Jitted device-side forward (everything after topology construction)
# ----------------------------------------------------------------------------
@partial(jax.jit, static_argnames=("n_pad", "tn", "e_pad", "te", "t_pad", "tp",
                                   "vmem_limit"))
def _device_forward(points, norms, val_idx, edge_index, triangles, deg,
                    *, n_pad, tn, e_pad, te, t_pad, tp, vmem_limit):
    ED_points = jnp.take(points, val_idx, axis=0).astype(jnp.float32)   # (N, 3)
    ED_norms = jnp.take(norms, val_idx, axis=0)                         # (N, 3)
    N = ED_points.shape[0]
    E = edge_index.shape[1]
    T = triangles.shape[1]

    # --- packed, lane-dense endpoint coordinates (fused by XLA under jit) ---
    # TODO(synk): gather endpoints in-kernel from a resident (3, N_pad) ED_points block to
    #             cut endpoint HBM traffic further; kept in XLA since cross-vreg lane gather
    #             lowering is fragile.
    pe = jnp.take(ED_points, edge_index.reshape(-1), axis=0)            # (2E, 3)
    pe = jnp.transpose(pe.reshape(2, E, 3), (0, 2, 1)).reshape(6, E)    # rows: p0.xyz, p1.xyz
    pe = jnp.pad(pe, ((0, 0), (0, e_pad - E)))
    e01 = jnp.pad(edge_index, ((0, 0), (0, e_pad - E)), constant_values=-1)   # (2, E_pad)

    pt = jnp.take(ED_points, triangles.reshape(-1), axis=0)             # (3T, 3)
    pt = jnp.transpose(pt.reshape(3, T, 3), (0, 2, 1)).reshape(9, T)    # rows: t0, t1, t2
    pt = jnp.pad(pt, ((0, 0), (0, t_pad - T)))

    # --- kernel 1: fused edge-lengths + per-node incident-length sums -------
    lens_row, sums_col = radii_pallas(pe, e01, n_pad, tn, te, vmem_limit)
    edges_lens = lens_row[0, :E]
    sums = sums_col[:N, 0]

    # radii = mean of incident edge lengths; torch semantics: empty -> NaN -> mean fixup
    deg_f = deg.astype(jnp.float32)
    finite = deg_f > 0.0
    radii = jnp.where(finite, sums / jnp.maximum(deg_f, 1.0), jnp.nan)
    mean_valid = (jnp.sum(jnp.where(finite, radii, 0.0))
                  / jnp.maximum(jnp.sum(finite.astype(jnp.float32)), 1.0))
    radii = jnp.where(finite, radii, mean_valid)

    # --- kernel 2: triangle areas --------------------------------------------
    areas_row = areas_pallas(pt, tp, vmem_limit)
    tri_areas = areas_row[0, :T]

    return ED_points, ED_norms, radii, edges_lens, tri_areas


# ----------------------------------------------------------------------------
# Forward pass (DirectDeformGraph.forward, edge_identify_method='grid_mesh')
# ----------------------------------------------------------------------------
def direct_deform_graph_forward(points, norms, index_map, mesh_step_size=1):
    """points, norms: (H*W, 3) f32; index_map: (H, W) int (candidate index, -1 invalid)."""
    index_map_np = np.asarray(index_map)

    # init_graph on the validity map (glue, host side)
    val_bool, edge_index_np, triangles_np = init_graph_np(index_map_np >= 0,
                                                          step=mesh_step_size)
    val_idx_np = index_map_np[val_bool]                          # candidate indices per ED node
    N = int(val_idx_np.shape[0])
    E = int(edge_index_np.shape[1])
    T = int(triangles_np.shape[1])

    # per-node incident-edge counts (pure topology -> host-side bincount)
    deg_np = np.bincount(edge_index_np.reshape(-1).astype(np.int64),
                         minlength=N)[:N].astype(np.int32)

    cfg = _select_config()
    E_pad, TE = _pad_tiles(E, cfg["tile_e"])
    N_pad, TN = _pad_tiles(N, cfg["tile_n"])
    T_pad, TP = _pad_tiles(T, cfg["tile_t"])

    val_idx = jnp.asarray(val_idx_np.astype(np.int32))
    edge_index = jnp.asarray(edge_index_np.astype(np.int32))     # (2, E)
    triangles = jnp.asarray(triangles_np.astype(np.int32))       # (3, T)
    deg = jnp.asarray(deg_np)

    ED_points, ED_norms, radii, edges_lens, tri_areas = _device_forward(
        points, norms, val_idx, edge_index, triangles, deg,
        n_pad=N_pad, tn=TN, e_pad=E_pad, te=TE, t_pad=T_pad, tp=TP,
        vmem_limit=cfg["vmem_limit"])

    graph = {
        "points": ED_points,
        "norms": ED_norms,
        "radii": radii,
        "edge_index": edge_index,
        "edges_lens": edges_lens,          # torch_distance(ED_points[e0], ED_points[e1])
        "triangles": triangles,
        "triangles_areas": tri_areas,
        "num": N,
        "param_num": N * 7,
    }
    return graph


# ----------------------------------------------------------------------------
# Main
# ----------------------------------------------------------------------------
if __name__ == "__main__":
    H, W = 8, 8                         # opt.height, opt.width (small)
    mesh_step_size = 1                  # opt.mesh_step_size

    key = jax.random.PRNGKey(0)
    kp, kn = jax.random.split(key)
    points = jax.random.normal(kp, (H * W, 3), dtype=jnp.float32)            # data.points
    norms = jax.random.normal(kn, (H * W, 3), dtype=jnp.float32)             # data.norms
    index_map = np.arange(H * W, dtype=np.int64).reshape(H, W)               # data.index_map (all valid)

    graph = direct_deform_graph_forward(points, norms, index_map,
                                        mesh_step_size=mesh_step_size)
    jax.block_until_ready(graph["edges_lens"])
    jax.block_until_ready(graph["radii"])
    jax.block_until_ready(graph["triangles_areas"])

    # --- reference check (pure numpy) ---
    pts = np.asarray(graph["points"])
    ei = np.asarray(graph["edge_index"])
    tri = np.asarray(graph["triangles"])
    ref_lens = np.linalg.norm(pts[ei[0]] - pts[ei[1]], axis=1)
    ref_radii = np.array([ref_lens[np.any(ei == k, axis=0)].mean()
                          for k in range(pts.shape[0])], dtype=np.float32)
    cr = np.cross(pts[tri[1]] - pts[tri[0]], pts[tri[2]] - pts[tri[0]], axis=1)
    ref_areas = 0.5 * np.sqrt((cr ** 2).sum(1) + 1e-13)

    assert np.allclose(np.asarray(graph["edges_lens"]), ref_lens, rtol=1e-4, atol=1e-5)
    assert np.allclose(np.asarray(graph["radii"]), ref_radii, rtol=1e-4, atol=1e-5)
    assert np.allclose(np.asarray(graph["triangles_areas"]), ref_areas, rtol=1e-4, atol=1e-5)

    print("KERNEL_OK")
</pallas_src>

<mosaic_0001>
module attributes {stable_mosaic.version = 11 : i64} {
  func.func @radii_kernel(%arg0: i32, %arg1: i32, %arg2: memref<6x256xf32, #tpu.memory_space<vmem>>, %arg3: memref<2x256xi32, #tpu.memory_space<vmem>>, %arg4: memref<1x256xf32, #tpu.memory_space<vmem>>, %arg5: memref<128x1xf32, #tpu.memory_space<vmem>>) attributes {dimension_semantics = [#tpu.dimension_semantics<arbitrary>, #tpu.dimension_semantics<arbitrary>], iteration_bounds = array<i64: 1, 1>, scalar_prefetch = 0 : i64, scratch_operands = 0 : i64, tpu.core_type = #tpu.core_type<tc>, window_params = [{transform_indices = @transform_0, window_bounds = array<i64: 6, 256>}, {transform_indices = @transform_1, window_bounds = array<i64: 2, 256>}, {transform_indices = @transform_2, window_bounds = array<i64: 1, 256>}, {transform_indices = @transform_3, window_bounds = array<i64: 128, 1>}]} {
    %c0 = arith.constant 0 : index
    %c0_0 = arith.constant 0 : index
    %0 = vector.load %arg2[%c0, %c0_0] : memref<6x256xf32, #tpu.memory_space<vmem>>, vector<6x256xf32>
    %1 = vector.extract_strided_slice %0 {offsets = [0, 0], sizes = [3, 256], strides = [1, 1]} : vector<6x256xf32> to vector<3x256xf32>
    %2 = vector.extract_strided_slice %0 {offsets = [3, 0], sizes = [3, 256], strides = [1, 1]} : vector<6x256xf32> to vector<3x256xf32>
    %3 = arith.subf %1, %2 : vector<3x256xf32>
    %4 = arith.mulf %3, %3 : vector<3x256xf32>
    %cst = arith.constant dense<0.000000e+00> : vector<256xf32>
    %5 = vector.multi_reduction <add>, %4, %cst [0] : vector<3x256xf32> to vector<256xf32>
    %6 = vector.shape_cast %5 : vector<256xf32> to vector<1x256xf32>
    %7 = math.sqrt %6 : vector<1x256xf32>
    %c0_1 = arith.constant 0 : index
    %c0_2 = arith.constant 0 : index
    %8 = vector.load %arg4[%c0_1, %c0_2] : memref<1x256xf32, #tpu.memory_space<vmem>>, vector<1x256xf32>
    tpu.vector_store %arg4[%c0_1, %c0_2], %7 {strides = array<i32>} : memref<1x256xf32, #tpu.memory_space<vmem>>, vector<1x256xf32>,
    %c128_i32 = arith.constant 128 : i32
    %9 = arith.muli %arg0, %c128_i32 : i32
    %c0_3 = arith.constant 0 : index
    %c0_4 = arith.constant 0 : index
    %10 = vector.load %arg3[%c0_3, %c0_4] : memref<2x256xi32, #tpu.memory_space<vmem>>, vector<1x256xi32>
    %11 = vector.broadcast %9 : i32 to vector<1x256xi32>
    %12 = arith.subi %10, %11 : vector<1x256xi32>
    %c1 = arith.constant 1 : index
    %c0_5 = arith.constant 0 : index
    %13 = vector.load %arg3[%c1, %c0_5] : memref<2x256xi32, #tpu.memory_space<vmem>>, vector<1x256xi32>
    %14 = vector.broadcast %9 : i32 to vector<1x256xi32>
    %15 = arith.subi %13, %14 : vector<1x256xi32>
    %16 = tpu.iota {dimensions = array<i32: 0>} : vector<128x256xi32>
    %17 = vector.broadcast %12 : vector<1x256xi32> to vector<128x256xi32>
    %18 = arith.cmpi eq, %16, %17 : vector<128x256xi32>
    %19 = vector.broadcast %15 : vector<1x256xi32> to vector<128x256xi32>
    %20 = arith.cmpi eq, %16, %19 : vector<128x256xi32>
    %21 = arith.ori %18, %20 : vector<128x256xi1>
    %cst_6 = arith.constant 0.000000e+00 : f32
    %22 = vector.shape_cast %7 : vector<1x256xf32> to vector<1x256xf32>
    %23 = vector.broadcast %22 : vector<1x256xf32> to vector<128x256xf32>
    %24 = vector.broadcast %cst_6 : f32 to vector<128x256xf32>
    %25 = arith.select %21, %23, %24 : vector<128x256xi1>, vector<128x256xf32>
    %c0_i32 = arith.constant 0 : i32
    %26 = arith.cmpi eq, %arg1, %c0_i32 : i32
    %27 = arith.extui %26 : i1 to i32
    %c0_i32_7 = arith.constant 0 : i32
    %28 = arith.cmpi ne, %27, %c0_i32_7 : i32
    scf.if %28 {
      %cst_13 = arith.constant 0.000000e+00 : f32
      %34 = vector.broadcast %cst_13 : f32 to vector<128x1xf32>
      %c0_14 = arith.constant 0 : index
      %c0_15 = arith.constant 0 : index
      %35 = vector.load %arg5[%c0_14, %c0_15] : memref<128x1xf32, #tpu.memory_space<vmem>>, vector<128x1xf32>
      tpu.vector_store %arg5[%c0_14, %c0_15], %34 {strides = array<i32>} : memref<128x1xf32, #tpu.memory_space<vmem>>, vector<128x1xf32>,
    } else {
    }
    %c0_8 = arith.constant 0 : index
    %c0_9 = arith.constant 0 : index
    %29 = vector.load %arg5[%c0_8, %c0_9] : memref<128x1xf32, #tpu.memory_space<vmem>>, vector<128x1xf32>
    %cst_10 = arith.constant dense<0.000000e+00> : vector<128xf32>
    %30 = vector.multi_reduction <add>, %25, %cst_10 [1] : vector<128x256xf32> to vector<128xf32>
    %31 = vector.shape_cast %30 : vector<128xf32> to vector<128x1xf32>
    %32 = arith.addf %29, %31 : vector<128x1xf32>
    %c0_11 = arith.constant 0 : index
    %c0_12 = arith.constant 0 : index
    %33 = vector.load %arg5[%c0_11, %c0_12] : memref<128x1xf32, #tpu.memory_space<vmem>>, vector<128x1xf32>
    tpu.vector_store %arg5[%c0_11, %c0_12], %32 {strides = array<i32>} : memref<128x1xf32, #tpu.memory_space<vmem>>, vector<128x1xf32>,
    return
  }
  func.func @transform_0(%arg0: i32, %arg1: i32) -> (i32, i32) {
    %c0_i32 = arith.constant 0 : i32
    %c0_i32_0 = arith.constant 0 : i32
    return %c0_i32, %arg1 : i32, i32
  }
  func.func @transform_1(%arg0: i32, %arg1: i32) -> (i32, i32) {
    %c0_i32 = arith.constant 0 : i32
    %c0_i32_0 = arith.constant 0 : i32
    return %c0_i32, %arg1 : i32, i32
  }
  func.func @transform_2(%arg0: i32, %arg1: i32) -> (i32, i32) {
    %c0_i32 = arith.constant 0 : i32
    %c0_i32_0 = arith.constant 0 : i32
    return %c0_i32, %arg1 : i32, i32
  }
  func.func @transform_3(%arg0: i32, %arg1: i32) -> (i32, i32) {
    %c0_i32 = arith.constant 0 : i32
    %c0_i32_0 = arith.constant 0 : i32
    return %arg0, %c0_i32 : i32, i32
  }
}

module attributes {stable_mosaic.version = 11 : i64} {
  func.func @areas_kernel(%arg0: i32, %arg1: memref<9x128xf32, #tpu.memory_space<vmem>>, %arg2: memref<1x128xf32, #tpu.memory_space<vmem>>) attributes {dimension_semantics = [#tpu.dimension_semantics<parallel>], iteration_bounds = array<i64: 1>, scalar_prefetch = 0 : i64, scratch_operands = 0 : i64, tpu.core_type = #tpu.core_type<tc>, window_params = [{transform_indices = @transform_0, window_bounds = array<i64: 9, 128>}, {transform_indices = @transform_1, window_bounds = array<i64: 1, 128>}]} {
    %c0 = arith.constant 0 : index
    %c0_0 = arith.constant 0 : index
    %0 = vector.load %arg1[%c0, %c0_0] : memref<9x128xf32, #tpu.memory_space<vmem>>, vector<9x128xf32>
    %1 = vector.extract_strided_slice %0 {offsets = [3, 0], sizes = [3, 128], strides = [1, 1]} : vector<9x128xf32> to vector<3x128xf32>
    %2 = vector.extract_strided_slice %0 {offsets = [0, 0], sizes = [3, 128], strides = [1, 1]} : vector<9x128xf32> to vector<3x128xf32>
    %3 = arith.subf %1, %2 : vector<3x128xf32>
    %4 = vector.extract_strided_slice %0 {offsets = [6, 0], sizes = [3, 128], strides = [1, 1]} : vector<9x128xf32> to vector<3x128xf32>
    %5 = vector.extract_strided_slice %0 {offsets = [0, 0], sizes = [3, 128], strides = [1, 1]} : vector<9x128xf32> to vector<3x128xf32>
    %6 = arith.subf %4, %5 : vector<3x128xf32>
    %7 = vector.extract_strided_slice %3 {offsets = [1, 0], sizes = [1, 128], strides = [1, 1]} : vector<3x128xf32> to vector<1x128xf32>
    %8 = vector.extract_strided_slice %6 {offsets = [2, 0], sizes = [1, 128], strides = [1, 1]} : vector<3x128xf32> to vector<1x128xf32>
    %9 = arith.mulf %7, %8 : vector<1x128xf32>
    %10 = vector.extract_strided_slice %3 {offsets = [2, 0], sizes = [1, 128], strides = [1, 1]} : vector<3x128xf32> to vector<1x128xf32>
    %11 = vector.extract_strided_slice %6 {offsets = [1, 0], sizes = [1, 128], strides = [1, 1]} : vector<3x128xf32> to vector<1x128xf32>
    %12 = arith.mulf %10, %11 : vector<1x128xf32>
    %13 = arith.subf %9, %12 : vector<1x128xf32>
    %14 = vector.extract_strided_slice %3 {offsets = [2, 0], sizes = [1, 128], strides = [1, 1]} : vector<3x128xf32> to vector<1x128xf32>
    %15 = vector.extract_strided_slice %6 {offsets = [0, 0], sizes = [1, 128], strides = [1, 1]} : vector<3x128xf32> to vector<1x128xf32>
    %16 = arith.mulf %14, %15 : vector<1x128xf32>
    %17 = vector.extract_strided_slice %3 {offsets = [0, 0], sizes = [1, 128], strides = [1, 1]} : vector<3x128xf32> to vector<1x128xf32>
    %18 = vector.extract_strided_slice %6 {offsets = [2, 0], sizes = [1, 128], strides = [1, 1]} : vector<3x128xf32> to vector<1x128xf32>
    %19 = arith.mulf %17, %18 : vector<1x128xf32>
    %20 = arith.subf %16, %19 : vector<1x128xf32>
    %21 = vector.extract_strided_slice %3 {offsets = [0, 0], sizes = [1, 128], strides = [1, 1]} : vector<3x128xf32> to vector<1x128xf32>
    %22 = vector.extract_strided_slice %6 {offsets = [1, 0], sizes = [1, 128], strides = [1, 1]} : vector<3x128xf32> to vector<1x128xf32>
    %23 = arith.mulf %21, %22 : vector<1x128xf32>
    %24 = vector.extract_strided_slice %3 {offsets = [1, 0], sizes = [1, 128], strides = [1, 1]} : vector<3x128xf32> to vector<1x128xf32>
    %25 = vector.extract_strided_slice %6 {offsets = [0, 0], sizes = [1, 128], strides = [1, 1]} : vector<3x128xf32> to vector<1x128xf32>
    %26 = arith.mulf %24, %25 : vector<1x128xf32>
    %27 = arith.subf %23, %26 : vector<1x128xf32>
    %28 = arith.mulf %13, %13 : vector<1x128xf32>
    %29 = arith.mulf %20, %20 : vector<1x128xf32>
    %30 = arith.addf %28, %29 : vector<1x128xf32>
    %31 = arith.mulf %27, %27 : vector<1x128xf32>
    %32 = arith.addf %30, %31 : vector<1x128xf32>
    %cst = arith.constant 9.99999982E-14 : f32
    %33 = vector.broadcast %cst : f32 to vector<1x128xf32>
    %34 = arith.addf %32, %33 : vector<1x128xf32>
    %35 = math.sqrt %34 : vector<1x128xf32>
    %cst_1 = arith.constant 5.000000e-01 : f32
    %36 = vector.broadcast %cst_1 : f32 to vector<1x128xf32>
    %37 = arith.mulf %36, %35 : vector<1x128xf32>
    %c0_2 = arith.constant 0 : index
    %c0_3 = arith.constant 0 : index
    %38 = vector.load %arg2[%c0_2, %c0_3] : memref<1x128xf32, #tpu.memory_space<vmem>>, vector<1x128xf32>
    tpu.vector_store %arg2[%c0_2, %c0_3], %37 {strides = array<i32>} : memref<1x128xf32, #tpu.memory_space<vmem>>, vector<1x128xf32>,
    return
  }
  func.func @transform_0(%arg0: i32) -> (i32, i32) {
    %c0_i32 = arith.constant 0 : i32
    %c0_i32_0 = arith.constant 0 : i32
    return %c0_i32, %arg0 : i32, i32
  }
  func.func @transform_1(%arg0: i32) -> (i32, i32) {
    %c0_i32 = arith.constant 0 : i32
    %c0_i32_0 = arith.constant 0 : i32
    return %c0_i32, %arg0 : i32, i32
  }
}

</mosaic_0001>

<bundles_post_ra>
// kernel: _device_forward.3
= control target key start
LH: loop header
LB: loop body
LE: loop exit
PB: predicated region body
PF: predicated region fallthrough
CT: control target
= control target key end

     0   :  { %s90_s0 = inlined_call_operand.vmem [shape: f32[9,128], index: 0, kind: input, shape index: {}]   ;;  %s91_s1 = inlined_call_operand.vmem [shape: f32[1,128], index: 1, kind: output, shape index: {}]  }
   0x1   :  { %v8_v0 = vld [vmem:[%s90_s0] sm:$0xff]  ;;  %v9_v1 = vld [vmem:[%s90_s0 + $0x8] sm:$0x1] }
   0x2   :  { %v11_v2 = vrot.slane %v8_v0, 5  ;;  %v14_v3 = vrot.slane %v8_v0, 2 }
   0x4   :  { %v13_v4 = vsub.f32 %v8_v0, %v11_v2  ;;  %v16_v5 = vsub.f32 %v8_v0, %v14_v3  ;;  %v17_v6 = vsub.f32 %v9_v1, %v14_v3 }
   0x6   :  { %v19_v7 = vrot.slane %v17_v6, 4  ;;  %v23_v8 = vrot.slane %v16_v5, 2  ;;  %v30_v9 = vrot.slane %v16_v5, 1  ;;  %v33_v10 = vrot.slane %v17_v6, 5 }
   0x7   :  { %v40_v11 = vrot.slane %v16_v5, 4 }
   0x8   :  { %v21_v12 = vmul.f32 %v19_v7, %v13_v4  ;;  %v25_v13 = vmul.f32 %v23_v8, %v13_v4  ;;  %v32_v14 = vmul.f32 %v30_v9, %v13_v4  ;;  %v35_v15 = vmul.f32 %v33_v10, %v13_v4 }
   0x9   :  { %v42_v16 = vmul.f32 %v40_v11, %v13_v4 }
   0xa   :  { %v27_v17 = vrot.slane %v25_v13, 1  ;;  %v37_v18 = vrot.slane %v35_v15, 6 }
   0xc   :  { %v29_v19 = vsub.f32 %v21_v12, %v27_v17  ;;  %v39_v20 = vsub.f32 %v32_v14, %v37_v18  ;;  %v43_v21 = vsub.f32 %v42_v16, %v27_v17 }
   0xe   :  { %v44_v22 = vmul.f32 %v29_v19, %v29_v19  ;;  %v45_v23 = vmul.f32 %v39_v20, %v39_v20  ;;  %v50_v24 = vmul.f32 %v43_v21, %v43_v21 }
  0x10   :  { %v47_v25 = vrot.slane %v45_v23, 1  ;;  %v52_v26 = vrot.slane %v50_v24, 7 }
  0x12   :  { %v49_v27 = vadd.f32 %v47_v25, %v44_v22 }
  0x14   :  { %v54_v28 = vadd.f32 %v52_v26, %v49_v27 }
  0x16   :  { %v55_v29 = vadd.f32 1e-13, %v54_v28 }
  0x18   :  { %69 = vrsqrt.f32 %v55_v29  ;;  %vm58_vm0 = vcmp.eq.f32.partialorder %v55_v29, inf  ;;  %v61_v31 = vand.u32 2147483648, %v55_v29  ;;  %vm60_vm1 = vcmp.eq.f32.partialorder %v55_v29, 0.0 }
  0x22   :  { %v70_v30 = vpop.eup %69 }
  0x23   :  { %v57_v32 = vmul.f32 %v70_v30, %v55_v29 }
  0x25   :  { %v59_v33 = vsel %vm58_vm0, %v55_v29, %v57_v32 }
  0x26   :  { %v62_v34 = vsel %vm60_vm1, %v61_v31, %v59_v33 }
  0x27   :  { %v63_v35 = vmul.f32 0.5, %v62_v34 }
  0x29   :  { %64 = vst [vmem:[%s91_s1 - $0x4] sm:$0x10] %v63_v35 }

// kernel: _device_forward.2
= control target key start
LH: loop header
LB: loop body
LE: loop exit
PB: predicated region body
PF: predicated region fallthrough
CT: control target
= control target key end

     0   :  { %vm1128_vm0 = vcmask 7168   ;;  %v414_v4 = vmov 0.0   ;;  %s1124_s0 = inlined_call_operand.vmem [shape: f32[6,256], index: 0, kind: input, shape index: {}]   ;;  %s1125_s1 = inlined_call_operand.vmem [shape: s32[2,256], index: 1, kind: input, shape index: {}]   ;;  %s1126_s2 = inlined_call_operand.hbm [shape: f32[1,256], index: 2, kind: output, shape index: {0}]   ;;  %s1127_s3 = inlined_call_operand.vmem [shape: f32[128,1], index: 3, kind: output, shape index: {1}]  }
   0x1   :  { %v14_v0 = vld [vmem:[%s1124_s0] sm:$0x3f]  ;;  %v15_v1 = vld [vmem:[%s1124_s0 + $0x8] sm:$0x3f]  ;;  %253 = vst.msk [vmem:[%s1127_s3 + $0x10] sm:$0xff] %vm1128_vm0, %v414_v4  ;;  %251 = vst.msk [vmem:[%s1127_s3] sm:$0xff] %vm1128_vm0, %v414_v4 }
   0x2   :  { %v18_v2 = vrot.slane %v14_v0, 3  ;;  %v19_v3 = vrot.slane %v15_v1, 3  ;;  %252 = vst.msk [vmem:[%s1127_s3 + $0x8] sm:$0xff] %vm1128_vm0, %v414_v4  ;;  %254 = vst.msk [vmem:[%s1127_s3 + $0x18] sm:$0xff] %vm1128_vm0, %v414_v4 }
   0x3   :  { %255 = vst.msk [vmem:[%s1127_s3 + $0x20] sm:$0xff] %vm1128_vm0, %v414_v4  ;;  %256 = vst.msk [vmem:[%s1127_s3 + $0x28] sm:$0xff] %vm1128_vm0, %v414_v4 }
   0x4   :  { %257 = vst.msk [vmem:[%s1127_s3 + $0x30] sm:$0xff] %vm1128_vm0, %v414_v4  ;;  %258 = vst.msk [vmem:[%s1127_s3 + $0x38] sm:$0xff] %vm1128_vm0, %v414_v4 }
   0x5   :  { %259 = vst.msk [vmem:[%s1127_s3 + $0x40] sm:$0xff] %vm1128_vm0, %v414_v4  ;;  %260 = vst.msk [vmem:[%s1127_s3 + $0x48] sm:$0xff] %vm1128_vm0, %v414_v4 }
   0x6   :  { %261 = vst.msk [vmem:[%s1127_s3 + $0x50] sm:$0xff] %vm1128_vm0, %v414_v4  ;;  %262 = vst.msk [vmem:[%s1127_s3 + $0x58] sm:$0xff] %vm1128_vm0, %v414_v4 }
   0x7   :  { %263 = vst.msk [vmem:[%s1127_s3 + $0x60] sm:$0xff] %vm1128_vm0, %v414_v4  ;;  %264 = vst.msk [vmem:[%s1127_s3 + $0x68] sm:$0xff] %vm1128_vm0, %v414_v4 }
   0x8   :  { %265 = vst.msk [vmem:[%s1127_s3 + $0x70] sm:$0xff] %vm1128_vm0, %v414_v4  ;;  %266 = vst.msk [vmem:[%s1127_s3 + $0x78] sm:$0xff] %vm1128_vm0, %v414_v4 }
   0x9   :  { %9 = vsyncpa [#allocation3], 0  ;;  %v22_v5 = vsub.f32 %v14_v0, %v18_v2  ;;  %v23_v6 = vsub.f32 %v15_v1, %v19_v3  ;;  %vm26_vm1 = vcmask 1042432   ;;  %v61_v11 = vlaneseq  ;;  %v79_v21 = vld [vmem:[%s1125_s1] ss:$2 sm:$0x3] }
   0xa   :  { %v382_v25 = vld [vmem:[%s1125_s1 + $0x1] ss:$2 sm:$0x3]  ;;  %v1141_v50 = vmov 0  ;;  %s416_s1 = smov [#allocation2]  }
   0xb   :  { %v24_v7 = vmul.f32 %v22_v5, %v22_v5  ;;  %v25_v8 = vmul.f32 %v23_v6, %v23_v6  ;;  %v508_v16 = vshrl.u32 %v61_v11, 7  ;;  %s370_s23 = sshll.u32 %s416_s1, 4  ;;  %s371_s23 = int_to_ptr.vmem [resolvable:$true] %s370_s23 }
   0xc   :  { %s390_s24 = scalar_lea.vmem %s371_s23, 32  ;;  %p395_p1 = scmp.lt.s32.totalorder %s371_s23, %s371_s23 }
   0xd   :  { %v27_v9 = vsel %vm26_vm1, %v24_v7, 0.0  ;;  %v34_v10 = vsel %vm26_vm1, %v25_v8, 0.0  ;;  %v104_v22 = vsub.s32 0, %v508_v16  ;;  %v108_v26 = vsub.s32 1, %v508_v16  ;;  %p391_p0 = scmp.ne.s32.totalorder %s371_s23, %s390_s24  ;;  %p396_p2 = scmp.lt.s32.totalorder %s390_s24, %s390_s24 }
   0xe   :  { %v28_v12 = vrot.slane %v27_v9, 4  ;;  %v35_v13 = vrot.slane %v34_v10, 4  ;;  %v88_v29 = vadd.s32 16, %v508_v16  ;;  %v89_v34 = vadd.s32 24, %v508_v16 }
   0xf   :  { %v523_v30 = vrot.slane %v79_v21, %v104_v22  ;;  %v525_v31 = vrot.slane %v382_v25, %v104_v22  ;;  %v528_v32 = vrot.slane %v79_v21, %v108_v26  ;;  %v530_v33 = vrot.slane %v382_v25, %v108_v26  ;;  %p397_p3 = por %p396_p2, %p395_p1 }
  0x10   :  { %v29_v14 = vadd.f32 %v28_v12, %v27_v9  ;;  %v36_v15 = vadd.f32 %v35_v13, %v34_v10  ;;  %v87_v35 = vadd.s32 8, %v508_v16  ;;  %v536_v36 = vadd.s32 40, %v508_v16 }
  0x11   :  { %vm114_vm2 = vcmp.eq.s32.totalorder %v88_v29, %v523_v30  ;;  %vm154_vm3 = vcmp.eq.s32.totalorder %v88_v29, %v525_v31  ;;  %v541_v37 = vadd.s32 32, %v508_v16  ;;  %v544_v38 = vadd.s32 56, %v508_v16  ;;  %p398_p4 = pnand %p397_p3, %p391_p0 }
  0x12   :  { %v30_v17 = vrot.slane %v29_v14, 2  ;;  %v37_v18 = vrot.slane %v36_v15, 2  ;;  %vm115_vm4 = vcmp.eq.s32.totalorder %v88_v29, %v528_v32  ;;  %vm155_vm5 = vcmp.eq.s32.totalorder %v88_v29, %v530_v33  ;;  %vm558_vm12 = vmor %vm114_vm2, %vm154_vm3 }
  0x13   :  { %vm110_vm6 = vcmp.eq.s32.totalorder %v508_v16, %v523_v30  ;;  %vm111_vm7 = vcmp.eq.s32.totalorder %v508_v16, %v528_v32  ;;  %vm150_vm8 = vcmp.eq.s32.totalorder %v508_v16, %v525_v31  ;;  %vm151_vm9 = vcmp.eq.s32.totalorder %v508_v16, %v530_v33  ;;  %vm566_vm0 = vmor %vm115_vm4, %vm155_vm5 }
  0x14   :  { %v31_v19 = vadd.f32 %v30_v17, %v29_v14  ;;  %v38_v20 = vadd.f32 %v37_v18, %v36_v15  ;;  %vm156_vm13 = vcmp.eq.s32.totalorder %v89_v34, %v525_v31  ;;  %vm157_vm14 = vcmp.eq.s32.totalorder %v89_v34, %v530_v33  ;;  %vm579_vm15 = vmor %vm110_vm6, %vm150_vm8 }
  0x15   :  { %vm152_vm10 = vcmp.eq.s32.totalorder %v87_v35, %v525_v31  ;;  %vm597_vm6 = vmor %vm111_vm7, %vm151_vm9  ;;  %v92_v43 = vadd.s32 48, %v508_v16  ;;  %vm1137_vm7 = vcmp.eq.s32.totalorder %v89_v34, %v523_v30  ;;  %vm1143_vm1 = vcmp.eq.s32.totalorder %v87_v35, %v523_v30 }
  0x16   :  { %v32_v23 = vrot.slane %v31_v19, 1  ;;  %v39_v24 = vrot.slane %v38_v20, 1  ;;  %vm614_vm9 = vmor %vm1137_vm7, %vm156_vm13  ;;  %vm1140_vm13 = vcmp.eq.s32.totalorder %v89_v34, %v528_v32  ;;  %vm165_vm11 = vcmp.eq.s32.totalorder %v544_v38, %v530_v33 }
  0x17   :  { %vm630_vm7 = vmor %vm1140_vm13, %vm157_vm14  ;;  %v95_v53 = vadd.s32 72, %v508_v16  ;;  %vm1146_vm14 = vcmp.eq.s32.totalorder %v87_v35, %v530_v33  ;;  %vm1147_vm13 = vcmp.eq.s32.totalorder %v87_v35, %v528_v32  ;;  %v94_v56 = vadd.s32 64, %v508_v16 }
  0x18   :  { %v518_v27 = vadd.f32 %v32_v23, %v31_v19  ;;  %v520_v28 = vadd.f32 %v39_v24, %v38_v20  ;;  %v1142_v50 = vsel %vm630_vm7, 4294967295, %v1141_v50  ;;  %vm640_vm4 = vmor %vm1143_vm1, %vm152_vm10  ;;  %v661_v57 = vadd.s32 88, %v508_v16 }
  0x19   :  { %vm654_vm7 = vmor %vm1147_vm13, %vm1146_vm14  ;;  %vm1150_vm1 = vcmp.eq.s32.totalorder %v536_v36, %v525_v31  ;;  %vm123_vm13 = vcmp.eq.s32.totalorder %v92_v43, %v528_v32  ;;  %vm162_vm10 = vcmp.eq.s32.totalorder %v92_v43, %v525_v31  ;;  %v96_v23 = vadd.s32 80, %v508_v16 }
  0x1a   :  { %386 = vrsqrt.f32 %v518_v27  ;;  %vm43_vm2 = vcmp.eq.f32.partialorder %v518_v27, inf  ;;  %v46_v45 = vand.u32 2147483648, %v518_v27  ;;  %vm45_vm8 = vcmp.eq.f32.partialorder %v518_v27, 0.0 }
  0x1b   :  { %388 = vrsqrt.f32 %v520_v28  ;;  %vm50_vm5 = vcmp.eq.f32.partialorder %v520_v28, inf  ;;  %v53_v49 = vand.u32 2147483648, %v520_v28  ;;  %vm52_vm3 = vcmp.eq.f32.partialorder %v520_v28, 0.0 }
  0x1c   :  { %v99_v25 = vadd.s32 104, %v508_v16  ;;  %v98_v29 = vadd.s32 96, %v508_v16  ;;  %v101_v40 = vadd.s32 120, %v508_v16 }
  0x24   :  { %v387_v44 = vpop.eup %386 }
  0x25   :  { %v389_v47 = vpop.eup %388  ;;  %v42_v48 = vmul.f32 %v387_v44, %v518_v27 }
  0x26   :  { %v49_v51 = vmul.f32 %v389_v47, %v520_v28 }
  0x27   :  { %v44_v54 = vsel %vm43_vm2, %v518_v27, %v42_v48  ;;  %vm1151_vm2 = vcmp.eq.s32.totalorder %v536_v36, %v523_v30 }
  0x28   :  { %v663_v58 = vsel %vm45_vm8, %v46_v45, %v44_v54  ;;  %v51_v59 = vsel %vm50_vm5, %v520_v28, %v49_v51  ;;  %vm672_vm14 = vmor %vm1151_vm2, %vm1150_vm1  ;;  %vm1154_vm5 = vcmp.eq.s32.totalorder %v536_v36, %v530_v33  ;;  %vm1155_vm8 = vcmp.eq.s32.totalorder %v536_v36, %v528_v32 }
  0x29   :  { %v678_v61 = vsel %vm52_vm3, %v53_v49, %v51_v59  ;;  %v218_v62 = vsel %vm558_vm12, %v663_v58, 0.0  ;;  %v214_v63 = vsel %vm579_vm15, %v663_v58, 0.0  ;;  %v220_v0 = vsel %vm614_vm9, %v663_v58, 0.0  ;;  %vm695_vm3 = vmor %vm1155_vm8, %vm1154_vm5 }
  0x2a   :  { %v219_v2 = vsel %vm566_vm0, %v678_v61, 0.0  ;;  %v215_v3 = vsel %vm597_vm6, %v678_v61, 0.0  ;;  %vm1158_vm12 = vnez %v1142_v50  ;;  %v216_v5 = vsel %vm640_vm4, %v663_v58, 0.0 }
  0x2b   :  { %v221_v4 = vsel %vm1158_vm12, %v678_v61, 0.0  ;;  %vm1159_vm15 = vcmp.eq.s32.totalorder %v541_v37, %v525_v31  ;;  %vm1160_vm9 = vcmp.eq.s32.totalorder %v541_v37, %v523_v30  ;;  %v289_v7 = vadd.f32 %v219_v2, %v218_v62 }
  0x2c   :  { %vm717_vm1 = vmor %vm1160_vm9, %vm1159_vm15  ;;  %v283_v8 = vadd.f32 %v215_v3, %v214_v63  ;;  %v217_v9 = vsel %vm654_vm7, %v678_v61, 0.0  ;;  %vm1163_vm0 = vcmp.eq.s32.totalorder %v541_v37, %v530_v33  ;;  %vm1164_vm4 = vcmp.eq.s32.totalorder %v541_v37, %v528_v32 }
  0x2d   :  { %vm730_vm6 = vmor %vm1164_vm4, %vm1163_vm0  ;;  %vm163_vm2 = vcmp.eq.s32.totalorder %v92_v43, %v530_v33  ;;  %vm1167_vm5 = vcmp.eq.s32.totalorder %v544_v38, %v525_v31  ;;  %vm1168_vm8 = vcmp.eq.s32.totalorder %v544_v38, %v523_v30  ;;  %vm128_vm7 = vcmp.eq.s32.totalorder %v95_v53, %v523_v30  ;;  %290 = vadd.xlane.f32.xlu1 %v289_v7 }
  0x2e   :  { %vm741_vm12 = vmor %vm1168_vm8, %vm1167_vm5  ;;  %vm129_vm15 = vcmp.eq.s32.totalorder %v95_v53, %v528_v32  ;;  %vm168_vm9 = vcmp.eq.s32.totalorder %v95_v53, %v525_v31  ;;  %vm169_vm0 = vcmp.eq.s32.totalorder %v95_v53, %v530_v33  ;;  %284 = vadd.xlane.f32.xlu0 %v283_v8  ;;  %v292_v13 = vadd.f32 %v221_v4, %v220_v0 }
  0x2f   :  { %v286_v14 = vadd.f32 %v217_v9, %v216_v5  ;;  %vm1171_vm4 = vcmp.eq.s32.totalorder %v544_v38, %v528_v32  ;;  %vm126_vm8 = vcmp.eq.s32.totalorder %v94_v56, %v523_v30  ;;  %v224_v17 = vsel %vm672_vm14, %v663_v58, 0.0  ;;  %vm784_vm14 = vmor %vm123_vm13, %vm163_vm2 }
  0x30   :  { %vm755_vm5 = vmor %vm1171_vm4, %vm165_vm11  ;;  %v225_v18 = vsel %vm695_vm3, %v678_v61, 0.0  ;;  %v222_v19 = vsel %vm717_vm1, %v663_v58, 0.0  ;;  %v223_v20 = vsel %vm730_vm6, %v678_v61, 0.0  ;;  %vm1174_vm11 = vcmp.eq.s32.totalorder %v92_v43, %v523_v30 }
  0x31   :  { %vm776_vm4 = vmor %vm1174_vm11, %vm162_vm10  ;;  %vm127_vm3 = vcmp.eq.s32.totalorder %v94_v56, %v528_v32  ;;  %vm166_vm1 = vcmp.eq.s32.totalorder %v94_v56, %v525_v31  ;;  %vm167_vm6 = vcmp.eq.s32.totalorder %v94_v56, %v530_v33  ;;  %vm132_vm13 = vcmp.eq.s32.totalorder %v661_v57, %v523_v30  ;;  %293 = vadd.xlane.f32.xlu1 %v292_v13 }
  0x32   :  { %vm796_vm10 = vmor %vm128_vm7, %vm168_vm9  ;;  %vm133_vm2 = vcmp.eq.s32.totalorder %v661_v57, %v528_v32  ;;  %vm172_vm11 = vcmp.eq.s32.totalorder %v661_v57, %v525_v31  ;;  %287 = vadd.xlane.f32.xlu0 %v286_v14  ;;  %v298_v26 = vadd.f32 %v225_v18, %v224_v17  ;;  %v295_v27 = vadd.f32 %v223_v20, %v222_v19 }
  0x33   :  { %vm811_vm7 = vmor %vm129_vm15, %vm169_vm0  ;;  %vm173_vm9 = vcmp.eq.s32.totalorder %v661_v57, %v530_v33  ;;  %v228_v34 = vsel %vm741_vm12, %v663_v58, 0.0  ;;  %v229_v35 = vsel %vm755_vm5, %v678_v61, 0.0  ;;  %v226_v36 = vsel %vm776_vm4, %v663_v58, 0.0 }
  0x34   :  { %v227_v37 = vsel %vm784_vm14, %v678_v61, 0.0  ;;  %vm834_vm15 = vmor %vm126_vm8, %vm166_vm1  ;;  %vm130_vm0 = vcmp.eq.s32.totalorder %v96_v23, %v523_v30  ;;  %vm131_vm5 = vcmp.eq.s32.totalorder %v96_v23, %v528_v32  ;;  %vm170_vm4 = vcmp.eq.s32.totalorder %v96_v23, %v525_v31 }
  0x35   :  { %vm842_vm12 = vmor %vm127_vm3, %vm167_vm6  ;;  %vm171_vm14 = vcmp.eq.s32.totalorder %v96_v23, %v530_v33  ;;  %vm136_vm3 = vcmp.eq.s32.totalorder %v99_v25, %v523_v30  ;;  %vm137_vm1 = vcmp.eq.s32.totalorder %v99_v25, %v528_v32  ;;  %vm176_vm6 = vcmp.eq.s32.totalorder %v99_v25, %v525_v31  ;;  %299 = vadd.xlane.f32.xlu1 %v298_v26 }
  0x36   :  { %vm856_vm8 = vmor %vm132_vm13, %vm172_vm11  ;;  %296 = vadd.xlane.f32.xlu0 %v295_v27  ;;  %v304_v42 = vadd.f32 %v229_v35, %v228_v34  ;;  %v301_v43 = vadd.f32 %v227_v37, %v226_v36  ;;  %vm177_vm11 = vcmp.eq.s32.totalorder %v99_v25, %v530_v33  ;;  %v232_v45 = vsel %vm796_vm10, %v663_v58, 0.0 }
  0x37   :  { %vm870_vm13 = vmor %vm133_vm2, %vm173_vm9  ;;  %v233_v46 = vsel %vm811_vm7, %v678_v61, 0.0  ;;  %v230_v47 = vsel %vm834_vm15, %v663_v58, 0.0  ;;  %v231_v48 = vsel %vm842_vm12, %v678_v61, 0.0  ;;  %vm134_vm7 = vcmp.eq.s32.totalorder %v98_v29, %v523_v30 }
  0x38   :  { %vm891_vm2 = vmor %vm130_vm0, %vm170_vm4  ;;  %vm135_vm9 = vcmp.eq.s32.totalorder %v98_v29, %v528_v32  ;;  %vm174_vm15 = vcmp.eq.s32.totalorder %v98_v29, %v525_v31  ;;  %v100_v51 = vadd.s32 112, %v508_v16  ;;  %vm175_vm0 = vcmp.eq.s32.totalorder %v98_v29, %v530_v33 }
  0x39   :  { %vm899_vm10 = vmor %vm131_vm5, %vm171_vm14  ;;  %vm140_vm5 = vcmp.eq.s32.totalorder %v101_v40, %v523_v30  ;;  %vm141_vm4 = vcmp.eq.s32.totalorder %v101_v40, %v528_v32  ;;  %vm180_vm14 = vcmp.eq.s32.totalorder %v101_v40, %v525_v31  ;;  %305 = vadd.xlane.f32.xlu1 %v304_v42  ;;  %v310_v53 = vadd.f32 %v233_v46, %v232_v45 }
  0x3a   :  { %vm911_vm12 = vmor %vm136_vm3, %vm176_vm6  ;;  %302 = vadd.xlane.f32.xlu0 %v301_v43  ;;  %v307_v54 = vadd.f32 %v231_v48, %v230_v47  ;;  %vm181_vm6 = vcmp.eq.s32.totalorder %v101_v40, %v530_v33  ;;  %v236_v56 = vsel %vm856_vm8, %v663_v58, 0.0  ;;  %v237_v57 = vsel %vm870_vm13, %v678_v61, 0.0 }
  0x3b   :  { %vm923_vm3 = vmor %vm137_vm1, %vm177_vm11  ;;  %v234_v59 = vsel %vm891_vm2, %v663_v58, 0.0  ;;  %v235_v60 = vsel %vm899_vm10, %v678_v61, 0.0  ;;  %vm138_vm13 = vcmp.eq.s32.totalorder %v100_v51, %v523_v30  ;;  %vm178_vm11 = vcmp.eq.s32.totalorder %v100_v51, %v525_v31 }
  0x3c   :  { %vm944_vm1 = vmor %vm134_vm7, %vm174_vm15  ;;  %vm139_vm10 = vcmp.eq.s32.totalorder %v100_v51, %v528_v32  ;;  %vm179_vm7 = vcmp.eq.s32.totalorder %v100_v51, %v530_v33  ;;  %v316_v1 = vadd.f32 %v237_v57, %v236_v56  ;;  %v313_v2 = vadd.f32 %v235_v60, %v234_v59 }
  0x3d   :  { %vm952_vm8 = vmor %vm135_vm9, %vm175_vm0  ;;  %311 = vadd.xlane.f32.xlu1 %v310_v53  ;;  %v240_v30 = vsel %vm911_vm12, %v663_v58, 0.0  ;;  %v241_v3 = vsel %vm923_vm3, %v678_v61, 0.0  ;;  %v238_v4 = vsel %vm944_vm1, %v663_v58, 0.0  ;;  %v415_v13 = vmov 1966171168  }
  0x3e   :  { %vm962_vm2 = vmor %vm140_vm5, %vm180_vm14  ;;  %308 = vadd.xlane.f32.xlu0 %v307_v54  ;;  %v239_v32 = vsel %vm952_vm8, %v678_v61, 0.0  ;;  %v322_v33 = vadd.f32 %v241_v3, %v240_v30  ;;  %v59_v14 = vunpack.c.l.s4 %v415_v13  ;;  %v57_v17 = vcombine.low %v663_v58, %v678_v61 }
  0x3f   :  { %vm972_vm9 = vmor %vm141_vm4, %vm181_vm6  ;;  %v319_v5 = vadd.f32 %v239_v32, %v238_v4  ;;  %v244_v6 = vsel %vm962_vm2, %v663_v58, 0.0  ;;  %vm75_vm12 = vcmp.lt.s32.totalorder %v61_v11, 256 }
  0x40   :  { %vm210_vm15 = vmor %vm138_vm13, %vm178_vm11  ;;  %v245_v7 = vsel %vm972_vm9, %v678_v61, 0.0  ;;  %v60_v15 = vunpack.c.0.s8 %v59_v14 }
  0x41   :  { %vm211_vm0 = vmor %vm139_vm10, %vm179_vm7  ;;  %317 = vadd.xlane.f32.xlu1 %v316_v1  ;;  %v242_v8 = vsel %vm210_vm15, %v663_v58, 0.0  ;;  %v328_v10 = vadd.f32 %v245_v7, %v244_v6 }
  0x42   :  { %314 = vadd.xlane.f32.xlu0 %v313_v2  ;;  %v243_v9 = vsel %vm211_vm0, %v678_v61, 0.0  ;;  %v63_v18 = vsub.s32 %v60_v15, %v508_v16 }
  0x43   :  { %v325_v12 = vadd.f32 %v243_v9, %v242_v8 }
  0x44   :  { %v64_v19 = vrot.slane %v57_v17, %v63_v18 }
  0x45   :  { %323 = vadd.xlane.f32.xlu1 %v322_v33 }
  0x46   :  { %320 = vadd.xlane.f32.xlu0 %v319_v5  ;;  %v71_v20 = vrot.slane %v64_v19, %v63_v18 }
  0x48   :  { %77 = vst.msk [vmem:[#allocation2] sm:$0x3] %vm75_vm12, %v71_v20 }
  0x49   :  { %329 = vadd.xlane.f32.xlu1 %v328_v10 }
  0x4a   :  { %326 = vadd.xlane.f32.xlu0 %v325_v12 }
  0x4b   :  { %401 = shalt.err (!%p398_p4)
}
  0x4c   :  { %s402_s27 = scalar_lea.hbm %s1126_s2, 32 }
  0x4d   :  { %p403_p5 = scmp.ne.s32.totalorder %s1126_s2, %s402_s27  ;;  %p406_p6 = scmp.lt.u32.totalorder %s402_s27, %s1126_s2 }
  0x4f   :  { %p408_p7 = pnand %p406_p6, %p403_p5 }
  0x51   :  { %411 = shalt.err (!%p408_p7)
}
  0x52   :  { %373 = dma.vmem_to_hbm [thread:$0]  %s371_s23, 32, %s1126_s2, [#allocation3]   ;;  %v269_v11 = vld [vmem:[%s1127_s3 + $0x10] sm:$0xff]  ;;  %v267_v16 = vld [vmem:[%s1127_s3] sm:$0xff]  ;;  %v270_v23 = vld [vmem:[%s1127_s3 + $0x18] sm:$0xff]  ;;  %vm1207_vm5 = vcmask 7168  }
  0x53   :  { %v268_v24 = vld [vmem:[%s1127_s3 + $0x8] sm:$0xff]  ;;  %vm1208_vm4 = vmmov %vm1207_vm5  ;;  %v271_v34 = vld [vmem:[%s1127_s3 + $0x20] sm:$0xff] }
  0x54   :  { %v272_v29 = vld [vmem:[%s1127_s3 + $0x28] sm:$0xff]  ;;  %vm1209_vm14 = vmmov %vm1208_vm4  ;;  %v274_v39 = vld [vmem:[%s1127_s3 + $0x38] sm:$0xff] }
  0x55   :  { %vm1210_vm3 = vmmov %vm1208_vm4  ;;  %v273_v40 = vld [vmem:[%s1127_s3 + $0x30] sm:$0xff]  ;;  %v276_v45 = vld [vmem:[%s1127_s3 + $0x48] sm:$0xff] }
  0x56   :  { %vm1211_vm6 = vmmov %vm1210_vm3  ;;  %v275_v46 = vld [vmem:[%s1127_s3 + $0x40] sm:$0xff]  ;;  %v278_v51 = vld [vmem:[%s1127_s3 + $0x58] sm:$0xff] }
  0x57   :  { %vm1212_vm1 = vmmov %vm1210_vm3  ;;  %v277_v52 = vld [vmem:[%s1127_s3 + $0x50] sm:$0xff]  ;;  %v280_v57 = vld [vmem:[%s1127_s3 + $0x68] sm:$0xff] }
  0x58   :  { %vm1213_vm8 = vmmov %vm1212_vm1  ;;  %v279_v59 = vld [vmem:[%s1127_s3 + $0x60] sm:$0xff]  ;;  %v282_v1 = vld [vmem:[%s1127_s3 + $0x78] sm:$0xff] }
  0x59   :  { %vm1214_vm13 = vmmov %vm1212_vm1  ;;  %v281_v2 = vld [vmem:[%s1127_s3 + $0x70] sm:$0xff] }
  0x5a   :  { %vm1215_vm11 = vmmov %vm1212_vm1 }
  0x5b   :  { %vm1216_vm2 = vmmov %vm1212_vm1 }
  0x5c   :  { %vm1217_vm10 = vmmov %vm1212_vm1 }
  0x5d   :  { %vm1218_vm7 = vmmov %vm1212_vm1 }
  0x5e   :  { %vm1219_vm9 = vmmov %vm1212_vm1 }
  0x5f   :  { %vm1220_vm15 = vmmov %vm1212_vm1 }
  0x60   :  { %vm1221_vm0 = vmmov %vm1212_vm1 }
  0x61   :  { %vm1222_vm12 = vmmov %vm1221_vm0 }
  0xba   :  { %v291_v58 = vpop.xlane.xlu1 %290 }
  0xbb   :  { %v285_v61 = vpop.xlane.xlu0 %284  ;;  %v333_v21 = vadd.f32 %v291_v58, %v269_v11 }
  0xbc   :  { %v331_v22 = vadd.f32 %v285_v61, %v267_v16 }
  0xbd   :  { %350 = vst.msk [vmem:[%s1127_s3 + $0x10] sm:$0xff] %vm1207_vm5, %v333_v21 }
  0xbe   :  { %348 = vst.msk [vmem:[%s1127_s3] sm:$0xff] %vm1208_vm4, %v331_v22  ;;  %v294_v25 = vpop.xlane.xlu1 %293 }
  0xbf   :  { %v288_v26 = vpop.xlane.xlu0 %287  ;;  %v334_v27 = vadd.f32 %v294_v25, %v270_v23 }
  0xc0   :  { %v332_v28 = vadd.f32 %v288_v26, %v268_v24 }
  0xc1   :  { %351 = vst.msk [vmem:[%s1127_s3 + $0x18] sm:$0xff] %vm1209_vm14, %v334_v27 }
  0xc2   :  { %349 = vst.msk [vmem:[%s1127_s3 + $0x8] sm:$0xff] %vm1210_vm3, %v332_v28  ;;  %v300_v35 = vpop.xlane.xlu1 %299 }
  0xc3   :  { %v297_v36 = vpop.xlane.xlu0 %296  ;;  %v336_v37 = vadd.f32 %v300_v35, %v272_v29 }
  0xc4   :  { %v335_v38 = vadd.f32 %v297_v36, %v271_v34 }
  0xc5   :  { %353 = vst.msk [vmem:[%s1127_s3 + $0x28] sm:$0xff] %vm1211_vm6, %v336_v37 }
  0xc6   :  { %352 = vst.msk [vmem:[%s1127_s3 + $0x20] sm:$0xff] %vm1212_vm1, %v335_v38  ;;  %v306_v41 = vpop.xlane.xlu1 %305 }
  0xc7   :  { %v303_v42 = vpop.xlane.xlu0 %302  ;;  %v338_v43 = vadd.f32 %v306_v41, %v274_v39 }
  0xc8   :  { %v337_v44 = vadd.f32 %v303_v42, %v273_v40 }
  0xc9   :  { %355 = vst.msk [vmem:[%s1127_s3 + $0x38] sm:$0xff] %vm1213_vm8, %v338_v43 }
  0xca   :  { %354 = vst.msk [vmem:[%s1127_s3 + $0x30] sm:$0xff] %vm1214_vm13, %v337_v44  ;;  %v312_v47 = vpop.xlane.xlu1 %311 }
  0xcb   :  { %v309_v48 = vpop.xlane.xlu0 %308  ;;  %v340_v49 = vadd.f32 %v312_v47, %v276_v45 }
  0xcc   :  { %v339_v50 = vadd.f32 %v309_v48, %v275_v46 }
  0xcd   :  { %357 = vst.msk [vmem:[%s1127_s3 + $0x48] sm:$0xff] %vm1215_vm11, %v340_v49 }
  0xce   :  { %356 = vst.msk [vmem:[%s1127_s3 + $0x40] sm:$0xff] %vm1216_vm2, %v339_v50  ;;  %v318_v53 = vpop.xlane.xlu1 %317 }
  0xcf   :  { %v315_v54 = vpop.xlane.xlu0 %314  ;;  %v342_v55 = vadd.f32 %v318_v53, %v278_v51 }
  0xd0   :  { %v341_v56 = vadd.f32 %v315_v54, %v277_v52 }
  0xd1   :  { %359 = vst.msk [vmem:[%s1127_s3 + $0x58] sm:$0xff] %vm1217_vm10, %v342_v55 }
  0xd2   :  { %358 = vst.msk [vmem:[%s1127_s3 + $0x50] sm:$0xff] %vm1218_vm7, %v341_v56  ;;  %v324_v60 = vpop.xlane.xlu1 %323 }
  0xd3   :  { %v321_v62 = vpop.xlane.xlu0 %320  ;;  %v344_v63 = vadd.f32 %v324_v60, %v280_v57 }
  0xd4   :  { %v343_v0 = vadd.f32 %v321_v62, %v279_v59 }
  0xd5   :  { %361 = vst.msk [vmem:[%s1127_s3 + $0x68] sm:$0xff] %vm1219_vm9, %v344_v63 }
  0xd6   :  { %360 = vst.msk [vmem:[%s1127_s3 + $0x60] sm:$0xff] %vm1220_vm15, %v343_v0  ;;  %v330_v31 = vpop.xlane.xlu1 %329 }
  0xd7   :  { %v327_v30 = vpop.xlane.xlu0 %326  ;;  %v346_v3 = vadd.f32 %v330_v31, %v282_v1 }
  0xd8   :  { %v345_v4 = vadd.f32 %v327_v30, %v281_v2 }
  0xd9   :  { %363 = vst.msk [vmem:[%s1127_s3 + $0x78] sm:$0xff] %vm1221_vm0, %v346_v3 }
  0xda   :  { %362 = vst.msk [vmem:[%s1127_s3 + $0x70] sm:$0xff] %vm1222_vm12, %v345_v4 }
  0xdb   :  { %412 = dma.done.wait [#allocation3], 32  }
  0xdc   :  { %413 = vsyncadd [#allocation3], 4294967264 }
  0xdd   :  { %381 = vsyncpa [#allocation3], 1 }

</bundles_post_ra>
